<compile_context>
chip_gen: v6e
topology: v6e:2x2x1
jax: 0.10.0
libtpu: 0.0.40
codegen_flags: <defaults>
</compile_context>

<pallas_src>
import numpy as np
import jax
import jax.numpy as jnp
from jax.experimental import pallas as pl
from jax.experimental.pallas import tpu as pltpu

F_IN = 4        # logical input features
F_IN_PAD = 8    # padded to one sublane
H = 128         # hidden size (matches module)
F_OUT = 1       # logical output features
F_OUT_PAD = 8   # padded output lanes
TILE_M = 256    # batch rows per grid step (feeds the 256-wide MXU on v6e/v7x)


def _critic_kernel(x_ref, w0_ref, b0_ref, w1_ref, b1_ref, w2_ref, b2_ref, out_ref):
    """relu(x@W0+b0) -> relu(@W1+b1) -> @W2+b2 for one batch tile.

    Matmul operands are bf16, accumulation is f32 on the MXU; bias-add and
    ReLU are done in f32 on the VPU.
    """
    x = x_ref[...]                                                      # [TILE_M, 8] bf16
    h0 = jnp.dot(x, w0_ref[...], preferred_element_type=jnp.float32)   # [TILE_M, H] f32
    h0 = jnp.maximum(h0 + b0_ref[...], 0.0).astype(jnp.bfloat16)
    h1 = jnp.dot(h0, w1_ref[...], preferred_element_type=jnp.float32)  # [TILE_M, H] f32
    h1 = jnp.maximum(h1 + b1_ref[...], 0.0).astype(jnp.bfloat16)
    v = jnp.dot(h1, w2_ref[...], preferred_element_type=jnp.float32) + b2_ref[...]
    out_ref[...] = v                                                    # [TILE_M, 8] f32


def critic_forward_pallas(x_pad, params):
    """Run the padded, batched MLP forward through the Pallas kernel.

    Args:
      x_pad: [N_pad, F_IN_PAD] bf16 padded input, N_pad a multiple of TILE_M.
      params: dict with padded weights (bf16) / biases (f32).

    Returns:
      [N_pad, F_OUT_PAD] f32 padded output (valid values in column 0,
      rows [0, real_batch)).
    """
    w0, b0, w1, b1, w2, b2 = (params["w0"], params["b0"], params["w1"],
                              params["b1"], params["w2"], params["b2"])
    n_pad = x_pad.shape[0]
    assert n_pad % TILE_M == 0
    grid = (n_pad // TILE_M,)

    def resident(shape):
        # Weights/biases: same block for every grid step -> loaded once, stay in VMEM.
        return pl.BlockSpec(shape, lambda i: (0, 0))

    return pl.pallas_call(
        _critic_kernel,
        out_shape=jax.ShapeDtypeStruct((n_pad, F_OUT_PAD), jnp.float32),
        grid=grid,
        in_specs=[
            pl.BlockSpec((TILE_M, F_IN_PAD), lambda i: (i, 0)),  # x: tiled over batch
            resident((F_IN_PAD, H)),                             # W0
            resident((1, H)),                                    # b0
            resident((H, H)),                                    # W1
            resident((1, H)),                                    # b1
            resident((H, F_OUT_PAD)),                            # W2
            resident((1, F_OUT_PAD)),                            # b2
        ],
        out_specs=pl.BlockSpec((TILE_M, F_OUT_PAD), lambda i: (i, 0)),
        compiler_params=pltpu.CompilerParams(
            dimension_semantics=("parallel",)),                  # megacore-shardable
    )(x_pad, w0, b0, w1, b1, w2, b2)


def init_params(key):
    """Deterministic synthetic parameters, PyTorch-Linear-style uniform(-1/sqrt(fan_in), +).

    Weights are stored as [in, out] so the forward is x @ W + b (equivalent to
    PyTorch's Linear which stores W as [out, in] and computes x @ W.T + b).
    """
    ks = jax.random.split(key, 6)

    def uniform(k, shape, fan_in):
        bound = 1.0 / np.sqrt(fan_in)
        return jax.random.uniform(k, shape, jnp.float32, -bound, bound)

    w0 = uniform(ks[0], (F_IN, H), F_IN)
    b0 = uniform(ks[1], (H,), F_IN)
    w1 = uniform(ks[2], (H, H), H)
    b1 = uniform(ks[3], (H,), H)
    w2 = uniform(ks[4], (H, F_OUT), H)
    b2 = uniform(ks[5], (F_OUT,), H)

    # bf16 storage for the matmul operands (accumulation stays f32 in-kernel).
    w0_bf = w0.astype(jnp.bfloat16)
    w1_bf = w1.astype(jnp.bfloat16)
    w2_bf = w2.astype(jnp.bfloat16)

    padded = dict(
        w0=jnp.zeros((F_IN_PAD, H), jnp.bfloat16).at[:F_IN, :].set(w0_bf),
        b0=b0.reshape(1, H),
        w1=w1_bf,
        b1=b1.reshape(1, H),
        w2=jnp.zeros((H, F_OUT_PAD), jnp.bfloat16).at[:, :F_OUT].set(w2_bf),
        b2=jnp.zeros((1, F_OUT_PAD), jnp.float32).at[:, :F_OUT].set(b2),
    )
    # Reference uses the same bf16-rounded weights (back in f32) so only the
    # intermediate-activation rounding differs from the kernel.
    logical = dict(
        w0=w0_bf.astype(jnp.float32), b0=b0,
        w1=w1_bf.astype(jnp.float32), b1=b1,
        w2=w2_bf.astype(jnp.float32), b2=b2,
    )
    return logical, padded


def critic_values(states, padded_params):
    """Batched critic: states [N, 4] -> values [N, 1]."""
    states = jnp.asarray(states, jnp.float32).reshape(-1, F_IN)
    n = states.shape[0]
    n_pad = ((n + TILE_M - 1) // TILE_M) * TILE_M
    x_pad = jnp.zeros((n_pad, F_IN_PAD), jnp.bfloat16)
    x_pad = x_pad.at[:n, :F_IN].set(states.astype(jnp.bfloat16))
    out_pad = critic_forward_pallas(x_pad, padded_params)   # [n_pad, F_OUT_PAD]
    return out_pad[:n, :F_OUT]


def critic_model(state, padded_params):
    """Mirror of CriticModel.forward: state (4,) -> value tensor (1, 1)."""
    # _preprocessor: expand_dims(state, 0) -> (1, 4), cast to float32.
    x = jnp.asarray(state, jnp.float32).reshape(1, F_IN)
    return critic_values(x, padded_params)


def critic_values_ref(states, p):
    """Pure-JAX f32 reference (bf16-rounded weights / input) for verification."""
    x = jnp.asarray(states, jnp.float32).reshape(-1, F_IN)
    x = x.astype(jnp.bfloat16).astype(jnp.float32)
    h0 = jnp.maximum(x @ p["w0"] + p["b0"], 0.0)
    h1 = jnp.maximum(h0 @ p["w1"] + p["b1"], 0.0)
    return h1 @ p["w2"] + p["b2"]


def critic_model_ref(state, p):
    return critic_values_ref(jnp.asarray(state, jnp.float32).reshape(1, F_IN), p)


if __name__ == "__main__":
    key = jax.random.PRNGKey(0)
    k_params, k_state, k_batch = jax.random.split(key, 3)

    logical_params, padded_params = init_params(k_params)

    # Single environment state (4,) — exact mirror of the PyTorch forward.
    state = jax.random.normal(k_state, (F_IN,), jnp.float32)
    value = jax.block_until_ready(critic_model(state, padded_params))
    value_ref = critic_model_ref(state, logical_params)
    np.testing.assert_allclose(np.asarray(value), np.asarray(value_ref),
                               rtol=2e-2, atol=2e-2)
    assert value.shape == (1, 1)

    # Batched path: 300 states -> padded to 512 rows, grid of 2 batch tiles.
    states = jax.random.normal(k_batch, (300, F_IN), jnp.float32)
    values = jax.block_until_ready(critic_values(states, padded_params))
    values_ref = critic_values_ref(states, logical_params)
    np.testing.assert_allclose(np.asarray(values), np.asarray(values_ref),
                               rtol=2e-2, atol=2e-2)
    assert values.shape == (300, 1)

    print("KERNEL_OK")
</pallas_src>

<mosaic_0001>
module attributes {stable_mosaic.version = 11 : i64} {
  func.func @_critic_kernel(%arg0: i32, %arg1: memref<256x8xbf16, #tpu.memory_space<vmem>>, %arg2: memref<8x128xbf16, #tpu.memory_space<vmem>>, %arg3: memref<1x128xf32, #tpu.memory_space<vmem>>, %arg4: memref<128x128xbf16, #tpu.memory_space<vmem>>, %arg5: memref<1x128xf32, #tpu.memory_space<vmem>>, %arg6: memref<128x8xbf16, #tpu.memory_space<vmem>>, %arg7: memref<1x8xf32, #tpu.memory_space<vmem>>, %arg8: memref<256x8xf32, #tpu.memory_space<vmem>>) attributes {dimension_semantics = [#tpu.dimension_semantics<parallel>], iteration_bounds = array<i64: 1>, scalar_prefetch = 0 : i64, scratch_operands = 0 : i64, tpu.core_type = #tpu.core_type<tc>, window_params = [{transform_indices = @transform_0, window_bounds = array<i64: 256, 8>}, {pipeline_mode = #tpu.pipeline_mode<synchronous>, transform_indices = @transform_1, window_bounds = array<i64: 8, 128>}, {pipeline_mode = #tpu.pipeline_mode<synchronous>, transform_indices = @transform_2, window_bounds = array<i64: 1, 128>}, {pipeline_mode = #tpu.pipeline_mode<synchronous>, transform_indices = @transform_3, window_bounds = array<i64: 128, 128>}, {pipeline_mode = #tpu.pipeline_mode<synchronous>, transform_indices = @transform_4, window_bounds = array<i64: 1, 128>}, {pipeline_mode = #tpu.pipeline_mode<synchronous>, transform_indices = @transform_5, window_bounds = array<i64: 128, 8>}, {pipeline_mode = #tpu.pipeline_mode<synchronous>, transform_indices = @transform_6, window_bounds = array<i64: 1, 8>}, {transform_indices = @transform_7, window_bounds = array<i64: 256, 8>}]} {
    %c0 = arith.constant 0 : index
    %c0_0 = arith.constant 0 : index
    %0 = vector.load %arg1[%c0, %c0_0] : memref<256x8xbf16, #tpu.memory_space<vmem>>, vector<256x8xbf16>
    %c0_1 = arith.constant 0 : index
    %c0_2 = arith.constant 0 : index
    %1 = vector.load %arg2[%c0_1, %c0_2] : memref<8x128xbf16, #tpu.memory_space<vmem>>, vector<8x128xbf16>
    %cst = arith.constant dense<0.000000e+00> : vector<256x128xf32>
    %2 = tpu.matmul %0, %1, %cst {dimension_numbers = #tpu.dot_dimension_numbers<[1], [0], [0], [1], [0, 0, 1, 1], [], []>} : vector<256x8xbf16>, vector<8x128xbf16>, vector<256x128xf32> -> vector<256x128xf32>
    %c0_3 = arith.constant 0 : index
    %c0_4 = arith.constant 0 : index
    %3 = vector.load %arg3[%c0_3, %c0_4] : memref<1x128xf32, #tpu.memory_space<vmem>>, vector<1x128xf32>
    %4 = vector.broadcast %3 : vector<1x128xf32> to vector<256x128xf32>
    %5 = arith.addf %2, %4 : vector<256x128xf32>
    %cst_5 = arith.constant 0.000000e+00 : f32
    %6 = vector.broadcast %cst_5 : f32 to vector<256x128xf32>
    %7 = arith.maximumf %5, %6 : vector<256x128xf32>
    %8 = arith.truncf %7 : vector<256x128xf32> to vector<256x128xbf16>
    %c0_6 = arith.constant 0 : index
    %c0_7 = arith.constant 0 : index
    %9 = vector.load %arg4[%c0_6, %c0_7] : memref<128x128xbf16, #tpu.memory_space<vmem>>, vector<128x128xbf16>
    %cst_8 = arith.constant dense<0.000000e+00> : vector<256x128xf32>
    %10 = tpu.matmul %8, %9, %cst_8 {dimension_numbers = #tpu.dot_dimension_numbers<[1], [0], [0], [1], [0, 0, 1, 1], [], []>} : vector<256x128xbf16>, vector<128x128xbf16>, vector<256x128xf32> -> vector<256x128xf32>
    %c0_9 = arith.constant 0 : index
    %c0_10 = arith.constant 0 : index
    %11 = vector.load %arg5[%c0_9, %c0_10] : memref<1x128xf32, #tpu.memory_space<vmem>>, vector<1x128xf32>
    %12 = vector.broadcast %11 : vector<1x128xf32> to vector<256x128xf32>
    %13 = arith.addf %10, %12 : vector<256x128xf32>
    %cst_11 = arith.constant 0.000000e+00 : f32
    %14 = vector.broadcast %cst_11 : f32 to vector<256x128xf32>
    %15 = arith.maximumf %13, %14 : vector<256x128xf32>
    %16 = arith.truncf %15 : vector<256x128xf32> to vector<256x128xbf16>
    %c0_12 = arith.constant 0 : index
    %c0_13 = arith.constant 0 : index
    %17 = vector.load %arg6[%c0_12, %c0_13] : memref<128x8xbf16, #tpu.memory_space<vmem>>, vector<128x8xbf16>
    %cst_14 = arith.constant dense<0.000000e+00> : vector<256x8xf32>
    %18 = tpu.matmul %16, %17, %cst_14 {dimension_numbers = #tpu.dot_dimension_numbers<[1], [0], [0], [1], [0, 0, 1, 1], [], []>} : vector<256x128xbf16>, vector<128x8xbf16>, vector<256x8xf32> -> vector<256x8xf32>
    %c0_15 = arith.constant 0 : index
    %c0_16 = arith.constant 0 : index
    %19 = vector.load %arg7[%c0_15, %c0_16] : memref<1x8xf32, #tpu.memory_space<vmem>>, vector<1x8xf32>
    %20 = vector.broadcast %19 : vector<1x8xf32> to vector<256x8xf32>
    %21 = arith.addf %18, %20 : vector<256x8xf32>
    %c0_17 = arith.constant 0 : index
    %c0_18 = arith.constant 0 : index
    %22 = vector.load %arg8[%c0_17, %c0_18] : memref<256x8xf32, #tpu.memory_space<vmem>>, vector<256x8xf32>
    tpu.vector_store %arg8[%c0_17, %c0_18], %21 {strides = array<i32>} : memref<256x8xf32, #tpu.memory_space<vmem>>, vector<256x8xf32>,
    return
  }
  func.func @transform_0(%arg0: i32) -> (i32, i32) {
    %c0_i32 = arith.constant 0 : i32
    %c0_i32_0 = arith.constant 0 : i32
    return %arg0, %c0_i32 : i32, i32
  }
  func.func @transform_1(%arg0: i32) -> (i32, i32) {
    %c0_i32 = arith.constant 0 : i32
    %c0_i32_0 = arith.constant 0 : i32
    %c0_i32_1 = arith.constant 0 : i32
    return %c0_i32, %c0_i32_0 : i32, i32
  }
  func.func @transform_2(%arg0: i32) -> (i32, i32) {
    %c0_i32 = arith.constant 0 : i32
    %c0_i32_0 = arith.constant 0 : i32
    %c0_i32_1 = arith.constant 0 : i32
    return %c0_i32, %c0_i32_0 : i32, i32
  }
  func.func @transform_3(%arg0: i32) -> (i32, i32) {
    %c0_i32 = arith.constant 0 : i32
    %c0_i32_0 = arith.constant 0 : i32
    %c0_i32_1 = arith.constant 0 : i32
    return %c0_i32, %c0_i32_0 : i32, i32
  }
  func.func @transform_4(%arg0: i32) -> (i32, i32) {
    %c0_i32 = arith.constant 0 : i32
    %c0_i32_0 = arith.constant 0 : i32
    %c0_i32_1 = arith.constant 0 : i32
    return %c0_i32, %c0_i32_0 : i32, i32
  }
  func.func @transform_5(%arg0: i32) -> (i32, i32) {
    %c0_i32 = arith.constant 0 : i32
    %c0_i32_0 = arith.constant 0 : i32
    %c0_i32_1 = arith.constant 0 : i32
    return %c0_i32, %c0_i32_0 : i32, i32
  }
  func.func @transform_6(%arg0: i32) -> (i32, i32) {
    %c0_i32 = arith.constant 0 : i32
    %c0_i32_0 = arith.constant 0 : i32
    %c0_i32_1 = arith.constant 0 : i32
    return %c0_i32, %c0_i32_0 : i32, i32
  }
  func.func @transform_7(%arg0: i32) -> (i32, i32) {
    %c0_i32 = arith.constant 0 : i32
    %c0_i32_0 = arith.constant 0 : i32
    return %arg0, %c0_i32 : i32, i32
  }
}

</mosaic_0001>

<bundles_post_ra>
// kernel: tpu_custom_call.1
= control target key start
LH: loop header
LB: loop body
LE: loop exit
PB: predicated region body
PF: predicated region fallthrough
CT: control target
= control target key end

     0   :  { %vm196_vm0 = vcmask 1043456   ;;  %vm147_vm1 = vcmask 64512   ;;  %s1642_s1 = inlined_call_operand.vmem [shape: bf16[8,128], index: 1, kind: input, shape index: {}]   ;;  %s1643_s0 = inlined_call_operand.vmem [shape: bf16[256,8], index: 0, kind: input, shape index: {}]   ;;  %s1644_s3 = inlined_call_operand.vmem [shape: bf16[128,128], index: 3, kind: input, shape index: {}]   ;;  %s1645_s5 = inlined_call_operand.vmem [shape: bf16[128,8], index: 5, kind: input, shape index: {}]   ;;  %s1646_s2 = inlined_call_operand.vmem [shape: f32[1,128], index: 2, kind: input, shape index: {}]   ;;  %s1647_s4 = inlined_call_operand.vmem [shape: f32[1,128], index: 4, kind: input, shape index: {}]   ;;  %s1648_s6 = inlined_call_operand.vmem [shape: f32[1,8], index: 6, kind: input, shape index: {}]   ;;  %s1649_s7 = inlined_call_operand.vmem [shape: f32[256,8], index: 7, kind: output, shape index: {}]  }
   0x1   :  { %v59_v0 = vld [vmem:[%s1642_s1] sm:$0xf]  ;;  %v1208_v3 = vld [vmem:[%s1643_s0 + $0x8] sm:$0xff]   ;;  %v1209_v4 = vld [vmem:[%s1643_s0 + $0x10] sm:$0xff]  }
   0x2   :  { %1205 = vmatprep.subr.msk.bf16.mxu0 %vm196_vm0, %v59_v0  ;;  %v198_v1 = vsel %vm196_vm0, %v59_v0, 0  ;;  %v1207_v2 = vld [vmem:[%s1643_s0] sm:$0xff]   ;;  %1206 = vmatprep.subr.msk.bf16.mxu1 %vm196_vm0, %v59_v0  ;;  %v1210_v5 = vld [vmem:[%s1643_s0 + $0x18] sm:$0xff]   ;;  %v1216_v8 = vld [vmem:[%s1643_s0 + $0x48] sm:$0xff]  }
   0x3   :  { %1074 = vmatpush3.bf16.msra.mxu0 %v198_v1  ;;  %1204 = vmatpush3.bf16.msra.mxu1 %v198_v1  ;;  %v1211_v6 = vld [vmem:[%s1643_s0 + $0x20] sm:$0xff]   ;;  %v1217_v9 = vld [vmem:[%s1643_s0 + $0x50] sm:$0xff]   ;;  %v1212_v10 = vld [vmem:[%s1643_s0 + $0x28] sm:$0xff]  }
   0x4   :  { %1075 = vmatprep.mubr.msk.bf16.mxu0 %vm147_vm1, %v1207_v2  ;;  %v1215_v7 = vld [vmem:[%s1643_s0 + $0x40] sm:$0xff]   ;;  %v1218_v11 = vld [vmem:[%s1643_s0 + $0x58] sm:$0xff]   ;;  %v1213_v14 = vld [vmem:[%s1643_s0 + $0x30] sm:$0xff]  }
   0x5   :  { %1091 = vmatprep.mubr.msk.bf16.mxu1 %vm147_vm1, %v1215_v7  ;;  %v1219_v12 = vld [vmem:[%s1643_s0 + $0x60] sm:$0xff]   ;;  %v1223_v13 = vld [vmem:[%s1644_s3 + $0x38] sm:$0xff]   ;;  %v1224_v15 = vld [vmem:[%s1644_s3 + $0x30] sm:$0xff]  }
   0x6   :  { %1076 = vmatmul.mubr.msk.bf16.vlgmr.msra.gmra.mxu0 %vm147_vm1, %v1208_v3  ;;  %1092 = vmatmul.mubr.msk.bf16.vlgmr.msra.gmra.mxu1 %vm147_vm1, %v1216_v8  ;;  %v1225_v16 = vld [vmem:[%s1644_s3 + $0x28] sm:$0xff]   ;;  %v1214_v18 = vld [vmem:[%s1643_s0 + $0x38] sm:$0xff]   ;;  %v1221_v19 = vld [vmem:[%s1643_s0 + $0x70] sm:$0xff]  }
   0x7   :  { %1079 = vmatprep.mubr.msk.bf16.mxu0 %vm147_vm1, %v1209_v4  ;;  %1095 = vmatprep.mubr.msk.bf16.mxu1 %vm147_vm1, %v1217_v9  ;;  %v1220_v17 = vld [vmem:[%s1643_s0 + $0x68] sm:$0xff]   ;;  %v1226_v20 = vld [vmem:[%s1644_s3 + $0x20] sm:$0xff]   ;;  %v1227_v21 = vld [vmem:[%s1644_s3 + $0x18] sm:$0xff]  }
   0x8   :  { %1107 = vmatprep.subr.bf16.mxu1 %v1223_v13  ;;  %v1222_v22 = vld [vmem:[%s1643_s0 + $0x78] sm:$0xff]   ;;  %v1228_v23 = vld [vmem:[%s1644_s3 + $0x10] sm:$0xff]   ;;  %v1229_v24 = vld [vmem:[%s1644_s3 + $0x8] sm:$0xff]  }
   0x9   :  { %1108 = vmatpush3.bf16.msra.mxu1 %v1223_v13  ;;  %v1230_v25 = vld [vmem:[%s1644_s3] sm:$0xff]   ;;  %v1231_v26 = vld [vmem:[%s1645_s5 + $0x38] sm:$0xff]   ;;  %v1232_v27 = vld [vmem:[%s1645_s5 + $0x30] sm:$0xff]  }
   0xa   :  { %1109 = vmatprep.subr.bf16.mxu1 %v1224_v15  ;;  %1155 = vmatprep.subr.bf16.mxu0 %v1231_v26  ;;  %v1233_v28 = vld [vmem:[%s1645_s5 + $0x28] sm:$0xff]   ;;  %v1234_v29 = vld [vmem:[%s1645_s5 + $0x20] sm:$0xff]   ;;  %v1235_v30 = vld [vmem:[%s1645_s5 + $0x18] sm:$0xff]  }
   0xb   :  { %1156 = vmatpush3.bf16.msra.mxu0 %v1231_v26  ;;  %v1388_v33 = vld [vmem:[%s1646_s2] ss:$0 sm:$0xff] }
   0xc   :  { %1157 = vmatprep.subr.bf16.mxu0 %v1232_v27 }
   0xd   :  { %1110 = vmatpush3.bf16.msra.mxu1 %v1224_v15 }
   0xe   :  { %1080 = vmatmul.mubr.msk.bf16.gmra.mxu0 %vm147_vm1, %v1210_v5  ;;  %1096 = vmatmul.mubr.msk.bf16.gmra.mxu1 %vm147_vm1, %v1218_v11 }
   0xf   :  { %1083 = vmatprep.mubr.msk.bf16.mxu0 %vm147_vm1, %v1211_v6  ;;  %1099 = vmatprep.mubr.msk.bf16.mxu1 %vm147_vm1, %v1219_v12 }
  0x10   :  { %1111 = vmatprep.subr.bf16.mxu1 %v1225_v16  ;;  %1158 = vmatpush3.bf16.msra.mxu0 %v1232_v27 }
  0x11   :  { %1112 = vmatpush3.bf16.msra.mxu1 %v1225_v16  ;;  %1159 = vmatprep.subr.bf16.mxu0 %v1233_v28 }
  0x12   :  { %1113 = vmatprep.subr.bf16.mxu1 %v1226_v20 }
  0x14   :  { %1160 = vmatpush3.bf16.msra.mxu0 %v1233_v28 }
  0x15   :  { %1114 = vmatpush3.bf16.msra.mxu1 %v1226_v20  ;;  %1161 = vmatprep.subr.bf16.mxu0 %v1234_v29 }
  0x16   :  { %1084 = vmatmul.mubr.msk.bf16.gmra.mxu0 %vm147_vm1, %v1212_v10  ;;  %1100 = vmatmul.mubr.msk.bf16.gmra.mxu1 %vm147_vm1, %v1220_v17 }
  0x17   :  { %1087 = vmatprep.mubr.msk.bf16.mxu0 %vm147_vm1, %v1213_v14  ;;  %1103 = vmatprep.mubr.msk.bf16.mxu1 %vm147_vm1, %v1221_v19 }
  0x18   :  { %1115 = vmatprep.subr.bf16.mxu1 %v1227_v21  ;;  %1162 = vmatpush3.bf16.msra.mxu0 %v1234_v29 }
  0x19   :  { %1116 = vmatpush3.bf16.msra.mxu1 %v1227_v21  ;;  %1163 = vmatprep.subr.bf16.mxu0 %v1235_v30 }
  0x1a   :  { %1117 = vmatprep.subr.bf16.mxu1 %v1228_v23 }
  0x1c   :  { %1164 = vmatpush3.bf16.msra.mxu0 %v1235_v30 }
  0x1d   :  { %1118 = vmatpush3.bf16.msra.mxu1 %v1228_v23 }
  0x1e   :  { %1088 = vmatmul.mubr.msk.bf16.gmra.mxu0 %vm147_vm1, %v1214_v18  ;;  %1104 = vmatmul.mubr.msk.bf16.gmra.mxu1 %vm147_vm1, %v1222_v22 }
  0x1f   :  { %1119 = vmatprep.subr.bf16.mxu1 %v1229_v24 }
  0x21   :  { %1120 = vmatpush3.bf16.msra.mxu1 %v1229_v24 }
  0x22   :  { %1121 = vmatprep.subr.bf16.mxu1 %v1230_v25 }
  0x25   :  { %1122 = vmatpush3.bf16.msra.mxu1 %v1230_v25 }
  0xc6   :  { %v1077_v31 = vpop.f32.mrf.mxu0  ;;  %v1394_v40 = vpop.f32.mrf.mxu1 }
  0xc7   :  { %v243_v37 = vadd.f32 %v1077_v31, %v1388_v33 }
  0xc8   :  { %v234_v32 = vpop.f32.mrf.mxu0  ;;  %v298_v45 = vpop.f32.mrf.mxu1 }
  0xc9   :  { %v235_v35 = vadd.f32 %v1388_v33, %v234_v32  ;;  %v363_v46 = vmax.f32 %v243_v37, 0.0  ;;  %v299_v21 = vadd.f32 %v1388_v33, %v298_v45 }
  0xca   :  { %v1078_v34 = vpop.f32.mrf.mxu0  ;;  %v1396_v49 = vpop.f32.mrf.mxu1 }
  0xcb   :  { %v246_v36 = vadd.f32 %v1078_v34, %v1388_v33  ;;  %v361_v43 = vmax.f32 %v235_v35, 0.0  ;;  %v377_v30 = vmax.f32 %v299_v21, 0.0  ;;  %v1443_v21 = vld [vmem:[%s1647_s4] ss:$0 sm:$0xff] }
  0xcc   :  { %v237_v38 = vpop.f32.mrf.mxu0  ;;  %v301_v54 = vpop.f32.mrf.mxu1 }
  0xcd   :  { %v238_v39 = vadd.f32 %v1388_v33, %v237_v38  ;;  %v364_v41 = vmax.f32 %v246_v36, 0.0  ;;  %v302_v22 = vadd.f32 %v1388_v33, %v301_v54 }
  0xce   :  { %v1081_v42 = vpop.f32.mrf.mxu0  ;;  %v1402_v58 = vpop.f32.mrf.mxu1 }
  0xcf   :  { %v362_v44 = vmax.f32 %v238_v39, 0.0  ;;  %v394_v50 = vpack.c.bf16 %v364_v41, %v363_v46  ;;  %v259_v55 = vadd.f32 %v1081_v42, %v1388_v33  ;;  %v378_v32 = vmax.f32 %v302_v22, 0.0 }
  0xd0   :  { %v250_v47 = vpop.f32.mrf.mxu0  ;;  %v314_v63 = vpop.f32.mrf.mxu1  ;;  %v310_v46 = vadd.f32 %v1396_v49, %v1388_v33 }
  0xd1   :  { %v393_v48 = vpack.c.bf16 %v362_v44, %v361_v43  ;;  %v251_v52 = vadd.f32 %v1388_v33, %v250_v47  ;;  %v367_v0 = vmax.f32 %v259_v55, 0.0  ;;  %v401_v41 = vpack.c.bf16 %v378_v32, %v377_v30 }
  0xd2   :  { %v1082_v51 = vpop.f32.mrf.mxu0  ;;  %v1098_v3 = vpop.f32.mrf.mxu1  ;;  %v315_v42 = vadd.f32 %v1388_v33, %v314_v63  ;;  %v307_v44 = vadd.f32 %v1394_v40, %v1388_v33  ;;  %v323_v40 = vadd.f32 %v1402_v58, %v1388_v33 }
  0xd3   :  { %v262_v53 = vadd.f32 %v1082_v51, %v1388_v33  ;;  %1123 = vmatprep.mubr.bf16.mxu1 %v393_v48  ;;  %v365_v61 = vmax.f32 %v251_v52, 0.0  ;;  %v380_v52 = vmax.f32 %v310_v46, 0.0  ;;  %v326_v49 = vadd.f32 %v1098_v3, %v1388_v33 }
  0xd4   :  { %v253_v56 = vpop.f32.mrf.mxu0  ;;  %1124 = vmatmul.mubr.bf16.vlgmr.msra.gmra.mxu1 %v394_v50  ;;  %v317_v8 = vpop.f32.mrf.mxu1  ;;  %v381_v48 = vmax.f32 %v315_v42, 0.0  ;;  %v379_v51 = vmax.f32 %v307_v44, 0.0 }
  0xd5   :  { %v254_v57 = vadd.f32 %v1388_v33, %v253_v56  ;;  %v368_v59 = vmax.f32 %v262_v53, 0.0  ;;  %v318_v43 = vadd.f32 %v1388_v33, %v317_v8  ;;  %v384_v63 = vmax.f32 %v326_v49, 0.0 }
  0xd6   :  { %v1085_v60 = vpop.f32.mrf.mxu0  ;;  %v1101_v12 = vpop.f32.mrf.mxu1 }
  0xd7   :  { %v366_v62 = vmax.f32 %v254_v57, 0.0  ;;  %v396_v4 = vpack.c.bf16 %v368_v59, %v367_v0  ;;  %v275_v9 = vadd.f32 %v1085_v60, %v1388_v33  ;;  %v382_v50 = vmax.f32 %v318_v43, 0.0 }
  0xd8   :  { %v266_v1 = vpop.f32.mrf.mxu0  ;;  %v330_v17 = vpop.f32.mrf.mxu1  ;;  %v402_v57 = vpack.c.bf16 %v380_v52, %v379_v51 }
  0xd9   :  { %v395_v2 = vpack.c.bf16 %v366_v62, %v365_v61  ;;  %v267_v6 = vadd.f32 %v1388_v33, %v266_v1  ;;  %v371_v18 = vmax.f32 %v275_v9, 0.0  ;;  %v403_v54 = vpack.c.bf16 %v382_v50, %v381_v48 }
  0xda   :  { %v1086_v5 = vpop.f32.mrf.mxu0  ;;  %v1102_v25 = vpop.f32.mrf.mxu1  ;;  %v331_v55 = vadd.f32 %v1388_v33, %v330_v17  ;;  %v383_v62 = vmax.f32 %v323_v40, 0.0 }
  0xdb   :  { %v278_v7 = vadd.f32 %v1086_v5, %v1388_v33  ;;  %1127 = vmatprep.mubr.bf16.mxu1 %v395_v2  ;;  %v369_v15 = vmax.f32 %v267_v6, 0.0  ;;  %v339_v6 = vadd.f32 %v1101_v12, %v1388_v33  ;;  %v342_v58 = vadd.f32 %v1102_v25, %v1388_v33  ;;  %v1236_v12 = vld [vmem:[%s1645_s5 + $0x10] sm:$0xff]  }
  0xdc   :  { %v269_v10 = vpop.f32.mrf.mxu0  ;;  %1128 = vmatmul.mubr.bf16.gmra.mxu1 %v396_v4  ;;  %v333_v35 = vpop.f32.mrf.mxu1  ;;  %v385_v60 = vmax.f32 %v331_v55, 0.0  ;;  %v404_v5 = vpack.c.bf16 %v384_v63, %v383_v62  ;;  %1165 = vmatprep.subr.bf16.mxu0 %v1236_v12 }
  0xdd   :  { %v270_v11 = vadd.f32 %v1388_v33, %v269_v10  ;;  %v372_v13 = vmax.f32 %v278_v7, 0.0  ;;  %v334_v56 = vadd.f32 %v1388_v33, %v333_v35  ;;  %v387_v8 = vmax.f32 %v339_v6, 0.0  ;;  %1166 = vmatpush3.bf16.msra.mxu0 %v1236_v12 }
  0xde   :  { %v1089_v14 = vpop.f32.mrf.mxu0  ;;  %v1105_v47 = vpop.f32.mrf.mxu1  ;;  %v388_v9 = vmax.f32 %v342_v58, 0.0 }
  0xdf   :  { %v370_v16 = vmax.f32 %v270_v11, 0.0  ;;  %v398_v23 = vpack.c.bf16 %v372_v13, %v371_v18  ;;  %v291_v28 = vadd.f32 %v1089_v14, %v1388_v33  ;;  %v386_v61 = vmax.f32 %v334_v56, 0.0  ;;  %v1237_v18 = vld [vmem:[%s1645_s5 + $0x8] sm:$0xff]  }
  0xe0   :  { %v282_v19 = vpop.f32.mrf.mxu0  ;;  %v346_v53 = vpop.f32.mrf.mxu1  ;;  %v406_v11 = vpack.c.bf16 %v388_v9, %v387_v8  ;;  %v355_v13 = vadd.f32 %v1105_v47, %v1388_v33  ;;  %1167 = vmatprep.subr.bf16.mxu0 %v1237_v18 }
  0xe1   :  { %v397_v20 = vpack.c.bf16 %v370_v16, %v369_v15  ;;  %v283_v26 = vadd.f32 %v1388_v33, %v282_v19  ;;  %v375_v38 = vmax.f32 %v291_v28, 0.0  ;;  %v405_v1 = vpack.c.bf16 %v386_v61, %v385_v60  ;;  %1168 = vmatpush3.bf16.msra.mxu0 %v1237_v18 }
  0xe2   :  { %v1090_v24 = vpop.f32.mrf.mxu0  ;;  %v1106_v59 = vpop.f32.mrf.mxu1  ;;  %v347_v2 = vadd.f32 %v1388_v33, %v346_v53  ;;  %v391_v15 = vmax.f32 %v355_v13, 0.0 }
  0xe3   :  { %v294_v27 = vadd.f32 %v1090_v24, %v1388_v33  ;;  %1131 = vmatprep.mubr.bf16.mxu1 %v397_v20  ;;  %v373_v36 = vmax.f32 %v283_v26, 0.0  ;;  %v358_v14 = vadd.f32 %v1106_v59, %v1388_v33 }
  0xe4   :  { %v285_v29 = vpop.f32.mrf.mxu0  ;;  %1132 = vmatmul.mubr.bf16.gmra.mxu1 %v398_v23  ;;  %v349_v0 = vpop.f32.mrf.mxu1  ;;  %v389_v3 = vmax.f32 %v347_v2, 0.0 }
  0xe5   :  { %v286_v31 = vadd.f32 %v1388_v33, %v285_v29  ;;  %v376_v34 = vmax.f32 %v294_v27, 0.0  ;;  %v350_v4 = vadd.f32 %v1388_v33, %v349_v0  ;;  %v392_v16 = vmax.f32 %v358_v14, 0.0  ;;  %v1238_v33 = vld [vmem:[%s1645_s5] sm:$0xff]  }
  0xe6   :  { %1169 = vmatprep.subr.bf16.mxu0 %v1238_v33 }
  0xe7   :  { %v374_v37 = vmax.f32 %v286_v31, 0.0  ;;  %v400_v45 = vpack.c.bf16 %v376_v34, %v375_v38  ;;  %v390_v7 = vmax.f32 %v350_v4, 0.0  ;;  %v408_v17 = vpack.c.bf16 %v392_v16, %v391_v15  ;;  %1170 = vmatpush3.bf16.msra.mxu0 %v1238_v33 }
  0xe9   :  { %v399_v39 = vpack.c.bf16 %v374_v37, %v373_v36  ;;  %v407_v10 = vpack.c.bf16 %v390_v7, %v389_v3 }
  0xeb   :  { %1135 = vmatprep.mubr.bf16.mxu1 %v399_v39 }
  0xec   :  { %1136 = vmatmul.mubr.bf16.gmra.mxu1 %v400_v45 }
  0xed   :  { %1139 = vmatprep.mubr.bf16.mxu1 %v401_v41 }
  0xf4   :  { %1140 = vmatmul.mubr.bf16.gmra.mxu1 %v402_v57 }
  0xf5   :  { %1143 = vmatprep.mubr.bf16.mxu1 %v403_v54 }
  0xfc   :  { %1144 = vmatmul.mubr.bf16.gmra.mxu1 %v404_v5 }
  0xfd   :  { %1147 = vmatprep.mubr.bf16.mxu1 %v405_v1 }
 0x104   :  { %1148 = vmatmul.mubr.bf16.gmra.mxu1 %v406_v11 }
 0x105   :  { %1151 = vmatprep.mubr.bf16.mxu1 %v407_v10 }
 0x10c   :  { %1152 = vmatmul.mubr.bf16.gmra.mxu1 %v408_v17 }
 0x194   :  { %v1125_v19 = vpop.f32.mrf.mxu1 }
 0x195   :  { %v523_v25 = vadd.f32 %v1125_v19, %v1443_v21 }
 0x196   :  { %v514_v20 = vpop.f32.mrf.mxu1 }
 0x197   :  { %v515_v23 = vadd.f32 %v1443_v21, %v514_v20  ;;  %v643_v32 = vmax.f32 %v523_v25, 0.0 }
 0x198   :  { %v1126_v22 = vpop.f32.mrf.mxu1 }
 0x199   :  { %v526_v24 = vadd.f32 %v1126_v22, %v1443_v21  ;;  %v641_v30 = vmax.f32 %v515_v23, 0.0 }
 0x19a   :  { %v517_v26 = vpop.f32.mrf.mxu1 }
 0x19b   :  { %v518_v27 = vadd.f32 %v1443_v21, %v517_v26  ;;  %v644_v28 = vmax.f32 %v526_v24, 0.0 }
 0x19c   :  { %v1129_v29 = vpop.f32.mrf.mxu1 }
 0x19d   :  { %v642_v31 = vmax.f32 %v518_v27, 0.0  ;;  %v674_v36 = vpack.c.bf16 %v644_v28, %v643_v32  ;;  %v539_v41 = vadd.f32 %v1129_v29, %v1443_v21 }
 0x19e   :  { %v530_v34 = vpop.f32.mrf.mxu1 }
 0x19f   :  { %v673_v35 = vpack.c.bf16 %v642_v31, %v641_v30  ;;  %v531_v38 = vadd.f32 %v1443_v21, %v530_v34  ;;  %v647_v48 = vmax.f32 %v539_v41, 0.0 }
 0x1a0   :  { %v1130_v37 = vpop.f32.mrf.mxu1 }
 0x1a1   :  { %v542_v39 = vadd.f32 %v1130_v37, %v1443_v21  ;;  %1171 = vmatprep.mubr.bf16.mxu0 %v673_v35  ;;  %v645_v46 = vmax.f32 %v531_v38, 0.0 }
 0x1a2   :  { %v533_v42 = vpop.f32.mrf.mxu1  ;;  %1172 = vmatmul.mubr.bf16.vlgmr.msra.gmra.mxu0 %v674_v36 }
 0x1a3   :  { %v534_v43 = vadd.f32 %v1443_v21, %v533_v42  ;;  %v648_v44 = vmax.f32 %v542_v39, 0.0 }
 0x1a4   :  { %v1133_v45 = vpop.f32.mrf.mxu1 }
 0x1a5   :  { %v646_v47 = vmax.f32 %v534_v43, 0.0  ;;  %v676_v52 = vpack.c.bf16 %v648_v44, %v647_v48  ;;  %v555_v56 = vadd.f32 %v1133_v45, %v1443_v21 }
 0x1a6   :  { %v546_v50 = vpop.f32.mrf.mxu1 }
 0x1a7   :  { %v675_v51 = vpack.c.bf16 %v646_v47, %v645_v46  ;;  %v547_v54 = vadd.f32 %v1443_v21, %v546_v50  ;;  %v651_v62 = vmax.f32 %v555_v56, 0.0 }
 0x1a8   :  { %v1134_v53 = vpop.f32.mrf.mxu1 }
 0x1a9   :  { %v558_v55 = vadd.f32 %v1134_v53, %v1443_v21  ;;  %1175 = vmatprep.mubr.bf16.mxu0 %v675_v51  ;;  %v649_v60 = vmax.f32 %v547_v54, 0.0 }
 0x1aa   :  { %v549_v57 = vpop.f32.mrf.mxu1  ;;  %1176 = vmatmul.mubr.bf16.gmra.mxu0 %v676_v52 }
 0x1ab   :  { %v550_v40 = vadd.f32 %v1443_v21, %v549_v57  ;;  %v652_v49 = vmax.f32 %v558_v55, 0.0 }
 0x1ac   :  { %v1137_v59 = vpop.f32.mrf.mxu1 }
 0x1ad   :  { %v650_v61 = vmax.f32 %v550_v40, 0.0  ;;  %v678_v1 = vpack.c.bf16 %v652_v49, %v651_v62  ;;  %v571_v6 = vadd.f32 %v1137_v59, %v1443_v21 }
 0x1ae   :  { %v562_v63 = vpop.f32.mrf.mxu1 }
 0x1af   :  { %v677_v0 = vpack.c.bf16 %v650_v61, %v649_v60  ;;  %v563_v4 = vadd.f32 %v1443_v21, %v562_v63  ;;  %v655_v11 = vmax.f32 %v571_v6, 0.0 }
 0x1b0   :  { %v1138_v2 = vpop.f32.mrf.mxu1 }
 0x1b1   :  { %v574_v5 = vadd.f32 %v1138_v2, %v1443_v21  ;;  %1179 = vmatprep.mubr.bf16.mxu0 %v677_v0  ;;  %v653_v9 = vmax.f32 %v563_v4, 0.0 }
 0x1b2   :  { %v565_v58 = vpop.f32.mrf.mxu1  ;;  %1180 = vmatmul.mubr.bf16.gmra.mxu0 %v678_v1 }
 0x1b3   :  { %v566_v3 = vadd.f32 %v1443_v21, %v565_v58  ;;  %v656_v7 = vmax.f32 %v574_v5, 0.0 }
 0x1b4   :  { %v1141_v8 = vpop.f32.mrf.mxu1 }
 0x1b5   :  { %v654_v10 = vmax.f32 %v566_v3, 0.0  ;;  %v680_v15 = vpack.c.bf16 %v656_v7, %v655_v11  ;;  %v587_v18 = vadd.f32 %v1141_v8, %v1443_v21  ;;  %v1480_v3 = vld [vmem:[%s1648_s6] ss:$0 sm:$0xff] }
 0x1b6   :  { %v578_v13 = vpop.f32.mrf.mxu1 }
 0x1b7   :  { %v679_v14 = vpack.c.bf16 %v654_v10, %v653_v9  ;;  %v579_v17 = vadd.f32 %v1443_v21, %v578_v13  ;;  %v659_v25 = vmax.f32 %v587_v18, 0.0 }
 0x1b8   :  { %v1142_v16 = vpop.f32.mrf.mxu1 }
 0x1b9   :  { %v590_v12 = vadd.f32 %v1142_v16, %v1443_v21  ;;  %1183 = vmatprep.mubr.bf16.mxu0 %v679_v14  ;;  %v657_v23 = vmax.f32 %v579_v17, 0.0 }
 0x1ba   :  { %v581_v33 = vpop.f32.mrf.mxu1  ;;  %1184 = vmatmul.mubr.bf16.gmra.mxu0 %v680_v15 }
 0x1bb   :  { %v582_v19 = vadd.f32 %v1443_v21, %v581_v33  ;;  %v660_v20 = vmax.f32 %v590_v12, 0.0 }
 0x1bc   :  { %v1145_v22 = vpop.f32.mrf.mxu1 }
 0x1bd   :  { %v658_v24 = vmax.f32 %v582_v19, 0.0  ;;  %v682_v28 = vpack.c.bf16 %v660_v20, %v659_v25  ;;  %v603_v32 = vadd.f32 %v1145_v22, %v1443_v21 }
 0x1be   :  { %v594_v26 = vpop.f32.mrf.mxu1 }
 0x1bf   :  { %v681_v27 = vpack.c.bf16 %v658_v24, %v657_v23  ;;  %v595_v30 = vadd.f32 %v1443_v21, %v594_v26  ;;  %v663_v41 = vmax.f32 %v603_v32, 0.0 }
 0x1c0   :  { %v1146_v29 = vpop.f32.mrf.mxu1 }
 0x1c1   :  { %v606_v31 = vadd.f32 %v1146_v29, %v1443_v21  ;;  %1187 = vmatprep.mubr.bf16.mxu0 %v681_v27  ;;  %v661_v38 = vmax.f32 %v595_v30, 0.0 }
 0x1c2   :  { %v597_v34 = vpop.f32.mrf.mxu1  ;;  %1188 = vmatmul.mubr.bf16.gmra.mxu0 %v682_v28 }
 0x1c3   :  { %v598_v35 = vadd.f32 %v1443_v21, %v597_v34  ;;  %v664_v36 = vmax.f32 %v606_v31, 0.0 }
 0x1c4   :  { %v1149_v37 = vpop.f32.mrf.mxu1 }
 0x1c5   :  { %v662_v39 = vmax.f32 %v598_v35, 0.0  ;;  %v684_v44 = vpack.c.bf16 %v664_v36, %v663_v41  ;;  %v619_v48 = vadd.f32 %v1149_v37, %v1443_v21 }
 0x1c6   :  { %v610_v42 = vpop.f32.mrf.mxu1 }
 0x1c7   :  { %v683_v43 = vpack.c.bf16 %v662_v39, %v661_v38  ;;  %v611_v46 = vadd.f32 %v1443_v21, %v610_v42  ;;  %v667_v56 = vmax.f32 %v619_v48, 0.0 }
 0x1c8   :  { %v1150_v45 = vpop.f32.mrf.mxu1 }
 0x1c9   :  { %v622_v47 = vadd.f32 %v1150_v45, %v1443_v21  ;;  %1191 = vmatprep.mubr.bf16.mxu0 %v683_v43  ;;  %v665_v54 = vmax.f32 %v611_v46, 0.0 }
 0x1ca   :  { %v613_v50 = vpop.f32.mrf.mxu1  ;;  %1192 = vmatmul.mubr.bf16.gmra.mxu0 %v684_v44 }
 0x1cb   :  { %v614_v51 = vadd.f32 %v1443_v21, %v613_v50  ;;  %v668_v52 = vmax.f32 %v622_v47, 0.0 }
 0x1cc   :  { %v1153_v53 = vpop.f32.mrf.mxu1 }
 0x1cd   :  { %v666_v55 = vmax.f32 %v614_v51, 0.0  ;;  %v686_v49 = vpack.c.bf16 %v668_v52, %v667_v56  ;;  %v635_v62 = vadd.f32 %v1153_v53, %v1443_v21 }
 0x1ce   :  { %v626_v57 = vpop.f32.mrf.mxu1 }
 0x1cf   :  { %v685_v40 = vpack.c.bf16 %v666_v55, %v665_v54  ;;  %v627_v60 = vadd.f32 %v1443_v21, %v626_v57  ;;  %v671_v5 = vmax.f32 %v635_v62, 0.0 }
 0x1d0   :  { %v1154_v59 = vpop.f32.mrf.mxu1 }
 0x1d1   :  { %v638_v61 = vadd.f32 %v1154_v59, %v1443_v21  ;;  %1195 = vmatprep.mubr.bf16.mxu0 %v685_v40  ;;  %v669_v2 = vmax.f32 %v627_v60, 0.0 }
 0x1d2   :  { %v629_v63 = vpop.f32.mrf.mxu1  ;;  %1196 = vmatmul.mubr.bf16.gmra.mxu0 %v686_v49 }
 0x1d3   :  { %v630_v0 = vadd.f32 %v1443_v21, %v629_v63  ;;  %v672_v1 = vmax.f32 %v638_v61, 0.0 }
 0x1d5   :  { %v670_v4 = vmax.f32 %v630_v0, 0.0  ;;  %v688_v58 = vpack.c.bf16 %v672_v1, %v671_v5 }
 0x1d7   :  { %v687_v6 = vpack.c.bf16 %v670_v4, %v669_v2 }
 0x1d9   :  { %1199 = vmatprep.mubr.bf16.mxu0 %v687_v6 }
 0x1da   :  { %1200 = vmatmul.mubr.bf16.gmra.mxu0 %v688_v58 }
 0x262   :  { %v1173_v7 = vpop.f32.mrf.mxu0 }
 0x263   :  { %v803_v8 = vadd.f32 %v1173_v7, %v1480_v3 }
 0x264   :  { %v794_v9 = vpop.f32.mrf.mxu0 }
 0x265   :  { %923 = vst.msk [vmem:[%s1649_s7 + $0x10] sm:$0xff] %vm147_vm1, %v803_v8  ;;  %v795_v21 = vadd.f32 %v1480_v3, %v794_v9 }
 0x266   :  { %v1174_v10 = vpop.f32.mrf.mxu0 }
 0x267   :  { %921 = vst.msk [vmem:[%s1649_s7] sm:$0xff] %vm147_vm1, %v795_v21  ;;  %v806_v11 = vadd.f32 %v1174_v10, %v1480_v3 }
 0x268   :  { %v797_v13 = vpop.f32.mrf.mxu0 }
 0x269   :  { %924 = vst.msk [vmem:[%s1649_s7 + $0x18] sm:$0xff] %vm147_vm1, %v806_v11  ;;  %v798_v14 = vadd.f32 %v1480_v3, %v797_v13 }
 0x26a   :  { %v1177_v15 = vpop.f32.mrf.mxu0 }
 0x26b   :  { %922 = vst.msk [vmem:[%s1649_s7 + $0x8] sm:$0xff] %vm147_vm1, %v798_v14  ;;  %v819_v16 = vadd.f32 %v1177_v15, %v1480_v3 }
 0x26c   :  { %v810_v17 = vpop.f32.mrf.mxu0 }
 0x26d   :  { %927 = vst.msk [vmem:[%s1649_s7 + $0x30] sm:$0xff] %vm147_vm1, %v819_v16  ;;  %v811_v12 = vadd.f32 %v1480_v3, %v810_v17 }
 0x26e   :  { %v1178_v18 = vpop.f32.mrf.mxu0 }
 0x26f   :  { %925 = vst.msk [vmem:[%s1649_s7 + $0x20] sm:$0xff] %vm147_vm1, %v811_v12  ;;  %v822_v33 = vadd.f32 %v1178_v18, %v1480_v3 }
 0x270   :  { %v813_v19 = vpop.f32.mrf.mxu0 }
 0x271   :  { %928 = vst.msk [vmem:[%s1649_s7 + $0x38] sm:$0xff] %vm147_vm1, %v822_v33  ;;  %v814_v20 = vadd.f32 %v1480_v3, %v813_v19 }
 0x272   :  { %v1181_v22 = vpop.f32.mrf.mxu0 }
 0x273   :  { %926 = vst.msk [vmem:[%s1649_s7 + $0x28] sm:$0xff] %vm147_vm1, %v814_v20  ;;  %v835_v23 = vadd.f32 %v1181_v22, %v1480_v3 }
 0x274   :  { %v826_v24 = vpop.f32.mrf.mxu0 }
 0x275   :  { %931 = vst.msk [vmem:[%s1649_s7 + $0x50] sm:$0xff] %vm147_vm1, %v835_v23  ;;  %v827_v25 = vadd.f32 %v1480_v3, %v826_v24 }
 0x276   :  { %v1182_v26 = vpop.f32.mrf.mxu0 }
 0x277   :  { %929 = vst.msk [vmem:[%s1649_s7 + $0x40] sm:$0xff] %vm147_vm1, %v827_v25  ;;  %v838_v27 = vadd.f32 %v1182_v26, %v1480_v3 }
 0x278   :  { %v829_v28 = vpop.f32.mrf.mxu0 }
 0x279   :  { %932 = vst.msk [vmem:[%s1649_s7 + $0x58] sm:$0xff] %vm147_vm1, %v838_v27  ;;  %v830_v29 = vadd.f32 %v1480_v3, %v829_v28 }
 0x27a   :  { %v1185_v30 = vpop.f32.mrf.mxu0 }
 0x27b   :  { %930 = vst.msk [vmem:[%s1649_s7 + $0x48] sm:$0xff] %vm147_vm1, %v830_v29  ;;  %v851_v31 = vadd.f32 %v1185_v30, %v1480_v3 }
 0x27c   :  { %v842_v32 = vpop.f32.mrf.mxu0 }
 0x27d   :  { %935 = vst.msk [vmem:[%s1649_s7 + $0x70] sm:$0xff] %vm147_vm1, %v851_v31  ;;  %v843_v34 = vadd.f32 %v1480_v3, %v842_v32 }
 0x27e   :  { %v1186_v35 = vpop.f32.mrf.mxu0 }
 0x27f   :  { %933 = vst.msk [vmem:[%s1649_s7 + $0x60] sm:$0xff] %vm147_vm1, %v843_v34  ;;  %v854_v36 = vadd.f32 %v1186_v35, %v1480_v3 }
 0x280   :  { %v845_v37 = vpop.f32.mrf.mxu0 }
 0x281   :  { %936 = vst.msk [vmem:[%s1649_s7 + $0x78] sm:$0xff] %vm147_vm1, %v854_v36  ;;  %v846_v38 = vadd.f32 %v1480_v3, %v845_v37 }
 0x282   :  { %v1189_v39 = vpop.f32.mrf.mxu0 }
 0x283   :  { %934 = vst.msk [vmem:[%s1649_s7 + $0x68] sm:$0xff] %vm147_vm1, %v846_v38  ;;  %v867_v41 = vadd.f32 %v1189_v39, %v1480_v3 }
 0x284   :  { %v858_v42 = vpop.f32.mrf.mxu0 }
 0x285   :  { %939 = vst.msk [vmem:[%s1649_s7 + $0x90] sm:$0xff] %vm147_vm1, %v867_v41  ;;  %v859_v43 = vadd.f32 %v1480_v3, %v858_v42 }
 0x286   :  { %v1190_v44 = vpop.f32.mrf.mxu0 }
 0x287   :  { %937 = vst.msk [vmem:[%s1649_s7 + $0x80] sm:$0xff] %vm147_vm1, %v859_v43  ;;  %v870_v45 = vadd.f32 %v1190_v44, %v1480_v3 }
 0x288   :  { %v861_v46 = vpop.f32.mrf.mxu0 }
 0x289   :  { %940 = vst.msk [vmem:[%s1649_s7 + $0x98] sm:$0xff] %vm147_vm1, %v870_v45  ;;  %v862_v47 = vadd.f32 %v1480_v3, %v861_v46 }
 0x28a   :  { %v1193_v48 = vpop.f32.mrf.mxu0 }
 0x28b   :  { %938 = vst.msk [vmem:[%s1649_s7 + $0x88] sm:$0xff] %vm147_vm1, %v862_v47  ;;  %v883_v50 = vadd.f32 %v1193_v48, %v1480_v3 }
 0x28c   :  { %v874_v51 = vpop.f32.mrf.mxu0 }
 0x28d   :  { %943 = vst.msk [vmem:[%s1649_s7 + $0xb0] sm:$0xff] %vm147_vm1, %v883_v50  ;;  %v875_v52 = vadd.f32 %v1480_v3, %v874_v51 }
 0x28e   :  { %v1194_v53 = vpop.f32.mrf.mxu0 }
 0x28f   :  { %941 = vst.msk [vmem:[%s1649_s7 + $0xa0] sm:$0xff] %vm147_vm1, %v875_v52  ;;  %v886_v54 = vadd.f32 %v1194_v53, %v1480_v3 }
 0x290   :  { %v877_v55 = vpop.f32.mrf.mxu0 }
 0x291   :  { %944 = vst.msk [vmem:[%s1649_s7 + $0xb8] sm:$0xff] %vm147_vm1, %v886_v54  ;;  %v878_v56 = vadd.f32 %v1480_v3, %v877_v55 }
 0x292   :  { %v1197_v57 = vpop.f32.mrf.mxu0 }
 0x293   :  { %942 = vst.msk [vmem:[%s1649_s7 + $0xa8] sm:$0xff] %vm147_vm1, %v878_v56  ;;  %v899_v40 = vadd.f32 %v1197_v57, %v1480_v3 }
 0x294   :  { %v890_v49 = vpop.f32.mrf.mxu0 }
 0x295   :  { %947 = vst.msk [vmem:[%s1649_s7 + $0xd0] sm:$0xff] %vm147_vm1, %v899_v40  ;;  %v891_v59 = vadd.f32 %v1480_v3, %v890_v49 }
 0x296   :  { %v1198_v60 = vpop.f32.mrf.mxu0 }
 0x297   :  { %945 = vst.msk [vmem:[%s1649_s7 + $0xc0] sm:$0xff] %vm147_vm1, %v891_v59  ;;  %v902_v61 = vadd.f32 %v1198_v60, %v1480_v3 }
 0x298   :  { %v893_v62 = vpop.f32.mrf.mxu0 }
 0x299   :  { %948 = vst.msk [vmem:[%s1649_s7 + $0xd8] sm:$0xff] %vm147_vm1, %v902_v61  ;;  %v894_v63 = vadd.f32 %v1480_v3, %v893_v62 }
 0x29a   :  { %v1201_v0 = vpop.f32.mrf.mxu0 }
 0x29b   :  { %946 = vst.msk [vmem:[%s1649_s7 + $0xc8] sm:$0xff] %vm147_vm1, %v894_v63  ;;  %v915_v1 = vadd.f32 %v1201_v0, %v1480_v3 }
 0x29c   :  { %v906_v2 = vpop.f32.mrf.mxu0 }
 0x29d   :  { %951 = vst.msk [vmem:[%s1649_s7 + $0xf0] sm:$0xff] %vm147_vm1, %v915_v1  ;;  %v907_v4 = vadd.f32 %v1480_v3, %v906_v2 }
 0x29e   :  { %v1202_v5 = vpop.f32.mrf.mxu0 }
 0x29f   :  { %949 = vst.msk [vmem:[%s1649_s7 + $0xe0] sm:$0xff] %vm147_vm1, %v907_v4  ;;  %v918_v6 = vadd.f32 %v1202_v5, %v1480_v3 }
 0x2a0   :  { %v909_v58 = vpop.f32.mrf.mxu0 }
 0x2a1   :  { %952 = vst.msk [vmem:[%s1649_s7 + $0xf8] sm:$0xff] %vm147_vm1, %v918_v6  ;;  %v910_v7 = vadd.f32 %v1480_v3, %v909_v58 }
 0x2a3   :  { %950 = vst.msk [vmem:[%s1649_s7 + $0xe8] sm:$0xff] %vm147_vm1, %v910_v7 }

</bundles_post_ra>
